<compile_context>
chip_gen: v6e
topology: v6e:2x2x1
jax: 0.10.0
libtpu: 0.0.40
codegen_flags: <defaults>
</compile_context>

<pallas_src>
import jax
import jax.numpy as jnp
from jax.experimental import pallas as pl
from jax.experimental.pallas import tpu as pltpu


def _pow6_kernel(x_ref, o_ref):
    x = x_ref[...]
    x2 = x * x                  # x ** 2
    o_ref[...] = x2 * x2 * x2   # (x ** 2) ** 3 == x ** 6  (minimal 3-mul chain)


def model_forward(x):
    """Reproduces: x = x**2; x = x**3  -> x**6, same shape & dtype."""
    orig_shape = x.shape
    n = x.size
    itemsize = jnp.dtype(x.dtype).itemsize

    # ---- choose a lane-dense, padding-free 2-D layout when possible ----------
    widths = (4096, 2048, 1024, 512, 256, 128)
    lanes = None
    # Prefer a width that also gives >= 8 sublane rows (full (8,128) vregs).
    for w in widths:
        if n % w == 0 and (n // w) >= 8:
            lanes = w
            break
    if lanes is None:
        for w in widths:
            if n % w == 0:
                lanes = w
                break

    if lanes is not None:
        padded = n
        x_flat = jnp.reshape(x, (-1,))
        rows = n // lanes
    else:
        # Ragged element count: pad flat length up to an (8,128)-aligned slab.
        # (Never triggers for the reference (2,4,16,16) input.)
        lanes = 128
        tile = 8 * lanes
        padded = pl.cdiv(n, tile) * tile
        x_flat = jnp.pad(jnp.reshape(x, (-1,)), (0, padded - n))
        rows = padded // lanes

    x2d = jnp.reshape(x_flat, (rows, lanes))
    total_bytes = rows * lanes * itemsize

    if total_bytes <= (2 << 20):
        # ---- small path: whole array is one VMEM block, no grid machinery ----
        out2d = pl.pallas_call(
            _pow6_kernel,
            out_shape=jax.ShapeDtypeStruct((rows, lanes), x.dtype),
            input_output_aliases={0: 0},
        )(x2d)
    else:
        # ---- large path: ~4 MiB tiles, cdiv-safe grid, parallel axis ----------
        target_tile_bytes = 4 << 20   # 4 MiB per buffer; in+out double-buffered
        #                               ~16 MiB — well under the scoped VMEM limit.
        block_rows = target_tile_bytes // (lanes * itemsize)
        block_rows = max(8, (block_rows // 8) * 8)
        block_rows = min(block_rows, max(8, (rows // 8) * 8))
        grid = (pl.cdiv(rows, block_rows),)   # Pallas masks the partial last block

        out2d = pl.pallas_call(
            _pow6_kernel,
            out_shape=jax.ShapeDtypeStruct((rows, lanes), x.dtype),
            grid=grid,
            in_specs=[pl.BlockSpec((block_rows, lanes), lambda i: (i, 0))],
            out_specs=pl.BlockSpec((block_rows, lanes), lambda i: (i, 0)),
            input_output_aliases={0: 0},
            compiler_params=pltpu.CompilerParams(
                dimension_semantics=("parallel",),
                vmem_limit_bytes=64 * 1024 * 1024,
            ),
        )(x2d)

    out_flat = jnp.reshape(out2d, (-1,))
    if padded != n:
        out_flat = out_flat[:n]
    return jnp.reshape(out_flat, orig_shape)


if __name__ == "__main__":
    key = jax.random.PRNGKey(0)
    x = jax.random.normal(key, (2, 4, 16, 16), dtype=jnp.float32)

    out = model_forward(x)
    out = jax.block_until_ready(out)

    # Sanity check against a pure-JAX reference of the PyTorch semantics.
    ref = (x ** 2) ** 3
    assert out.shape == x.shape and out.dtype == x.dtype
    assert jnp.allclose(out, ref, rtol=1e-5, atol=1e-5)

    print("KERNEL_OK")
</pallas_src>

<mosaic_0001>
module attributes {stable_mosaic.version = 11 : i64} {
  func.func @_pow6_kernel(%arg0: memref<8x256xf32, #tpu.memory_space<vmem>>, %arg1: memref<8x256xf32, #tpu.memory_space<vmem>>) attributes {dimension_semantics = [], scalar_prefetch = 0 : i64, scratch_operands = 0 : i64, tpu.core_type = #tpu.core_type<tc>} {
    %c0 = arith.constant 0 : index
    %c0_0 = arith.constant 0 : index
    %0 = vector.load %arg0[%c0, %c0_0] : memref<8x256xf32, #tpu.memory_space<vmem>>, vector<8x256xf32>
    %1 = arith.mulf %0, %0 : vector<8x256xf32>
    %2 = arith.mulf %1, %1 : vector<8x256xf32>
    %3 = arith.mulf %2, %1 : vector<8x256xf32>
    %c0_1 = arith.constant 0 : index
    %c0_2 = arith.constant 0 : index
    %4 = vector.load %arg1[%c0_1, %c0_2] : memref<8x256xf32, #tpu.memory_space<vmem>>, vector<8x256xf32>
    tpu.vector_store %arg1[%c0_1, %c0_2], %3 {strides = array<i32>} : memref<8x256xf32, #tpu.memory_space<vmem>>, vector<8x256xf32>,
    return
  }
}

</mosaic_0001>

<bundles_post_ra>
// kernel: tpu_custom_call.1
= control target key start
LH: loop header
LB: loop body
LE: loop exit
PB: predicated region body
PF: predicated region fallthrough
CT: control target
= control target key end

     0   :  { %6 = vsyncpa [#allocation3], 0  ;;  %s110_s0 = inlined_call_operand.hbm [shape: f32[8,256], index: 0, kind: input, shape index: {}, may-alias: {0,1}]   ;;  %s111_s1 = inlined_call_operand.hbm [shape: f32[8,256], index: 1, kind: output, shape index: {}, may-alias: {0,1}]  }
   0x1   :  { %7 = vsyncpa [#allocation4], 0  ;;  %s92_s6 = smov [#allocation2]  }
   0x2   :  { %s14_s7 = sshll.u32 %s92_s6, 4  ;;  %s15_s7 = int_to_ptr.vmem [resolvable:$true] %s14_s7 }
   0x3   :  { %s56_s8 = scalar_lea.vmem %s15_s7, 256  ;;  %p61_p1 = scmp.lt.s32.totalorder %s15_s7, %s15_s7 }
   0x4   :  { %p57_p0 = scmp.ne.s32.totalorder %s15_s7, %s56_s8  ;;  %p62_p2 = scmp.lt.s32.totalorder %s56_s8, %s56_s8 }
   0x6   :  { %p63_p3 = por %p62_p2, %p61_p1 }
   0x8   :  { %p64_p4 = pnand %p63_p3, %p57_p0 }
   0xa   :  { %67 = shalt.err (!%p64_p4)
}
   0xb   :  { %17 = dma.hbm_to_vmem [thread:$0]  %s110_s0, 256, %s15_s7, [#allocation3]  }
   0xc   :  { %88 = dma.done.wait [#allocation3], 256  }
   0xd   :  { %89 = vsyncadd [#allocation3], 4294967040  ;;  %v21_v0 = vld [vmem:[#allocation2] sm:$0xff]  ;;  %v22_v1 = vld [vmem:[#allocation2 + $0x8] sm:$0xff]  ;;  %s93_s11 = smov [#allocation5]  }
   0xe   :  { %v23_v2 = vmul.f32 %v21_v0, %v21_v0  ;;  %v24_v3 = vmul.f32 %v22_v1, %v22_v1  ;;  %s37_s12 = sshll.u32 %s93_s11, 4  ;;  %s38_s12 = int_to_ptr.vmem [resolvable:$true] %s37_s12 }
   0xf   :  { %s68_s13 = scalar_lea.vmem %s38_s12, 256  ;;  %p73_p6 = scmp.lt.s32.totalorder %s38_s12, %s38_s12 }
  0x10   :  { %v25_v4 = vmul.f32 %v23_v2, %v23_v2  ;;  %v26_v5 = vmul.f32 %v24_v3, %v24_v3  ;;  %p69_p5 = scmp.ne.s32.totalorder %s38_s12, %s68_s13  ;;  %p74_p7 = scmp.lt.s32.totalorder %s68_s13, %s68_s13 }
  0x12   :  { %v27_v6 = vmul.f32 %v25_v4, %v23_v2  ;;  %v28_v7 = vmul.f32 %v26_v5, %v24_v3  ;;  %p75_p8 = por %p74_p7, %p73_p6 }
  0x14   :  { %29 = vst [vmem:[#allocation5] sm:$0xff] %v27_v6  ;;  %30 = vst [vmem:[#allocation5 + $0x8] sm:$0xff] %v28_v7  ;;  %p76_p9 = pnand %p75_p8, %p69_p5 }
  0x16   :  { %79 = shalt.err (!%p76_p9)
}
  0x17   :  { %40 = dma.vmem_to_hbm [thread:$0]  %s38_s12, 256, %s111_s1, [#allocation4]  }
  0x18   :  { %90 = dma.done.wait [#allocation4], 256  }
  0x19   :  { %91 = vsyncadd [#allocation4], 4294967040 }
  0x1a   :  { %44 = vsyncpa [#allocation3], 1 }
  0x1b   :  { %45 = vsyncpa [#allocation4], 1 }

</bundles_post_ra>
